<compile_context>
chip_gen: v5e
topology: v5e:2x2
jax: 0.10.0
libtpu: 0.0.40
codegen_flags: <defaults>
</compile_context>

<pallas_src>
import functools
import math

import jax
import jax.numpy as jnp
from jax.experimental import pallas as pl
from jax.experimental.pallas import tpu as pltpu


LANE = 128         # TPU lane width
SUBLANE = 8        # TPU sublane width
NEG_SLOPE = 0.01   # nn.LeakyReLU default
BN_EPS = 1e-5      # nn.BatchNorm1d default
NEG_BIG = -1e30    # bias for padded logit lanes -> softmax prob exactly 0


def _round_up(x, m):
    return (x + m - 1) // m * m


# ---------------------------------------------------------------------------
# Fused Pallas kernel: [Linear -> LeakyReLU -> BN(eval)] * H  + Linear + Softmax
# ---------------------------------------------------------------------------
def _net_kernel(*refs, num_hidden: int):
    # refs = (x, [w, b, scale, shift] * num_hidden, w_last, b_last, out)
    x_ref = refs[0]
    o_ref = refs[-1]

    h = x_ref[...].astype(jnp.float32)
    idx = 1
    for _ in range(num_hidden):
        w = refs[idx][...]
        b = refs[idx + 1][...]
        scale = refs[idx + 2][...]
        shift = refs[idx + 3][...]
        idx += 4
        h = jnp.dot(h, w, preferred_element_type=jnp.float32) + b  # MXU
        h = jnp.where(h > 0, h, NEG_SLOPE * h)                     # LeakyReLU (VPU)
        h = h * scale + shift                                      # BN eval-mode (VPU)

    w_last = refs[idx][...]
    b_last = refs[idx + 1][...]
    logits = jnp.dot(h, w_last, preferred_element_type=jnp.float32) + b_last

    # numerically-stable softmax over lanes (padding lanes carry -1e30 bias)
    m = jnp.max(logits, axis=-1, keepdims=True)
    e = jnp.exp(logits - m)
    o_ref[...] = (e / jnp.sum(e, axis=-1, keepdims=True)).astype(o_ref.dtype)


# ---------------------------------------------------------------------------
# Net: deterministic parameter construction + fused Pallas forward
# ---------------------------------------------------------------------------
class Net:
    def __init__(self, input_size, layer_sizes, key):
        self.input_size = int(input_size)
        self.layer_sizes = list(layer_sizes)

        in_sizes = [self.input_size] + self.layer_sizes[:-1]
        out_sizes = self.layer_sizes
        n_layers = len(out_sizes)
        self.num_hidden = n_layers - 1

        keys = jax.random.split(key, 6 * n_layers)
        ki = 0

        # Linear params: weight stored PRE-TRANSPOSED as (Din, Dout).
        self.linears = []
        # BatchNorm params (per hidden layer): gamma, beta, running_mean, running_var.
        self.bns = []
        for i, (din, dout) in enumerate(zip(in_sizes, out_sizes)):
            bound = 1.0 / math.sqrt(din)
            w = jax.random.uniform(keys[ki], (din, dout), jnp.float32, -bound, bound)
            b = jax.random.uniform(keys[ki + 1], (dout,), jnp.float32, -bound, bound)
            ki += 2
            self.linears.append((w, b))
            if i + 1 < n_layers:
                gamma = 1.0 + 0.1 * jax.random.normal(keys[ki], (dout,), jnp.float32)
                beta = 0.1 * jax.random.normal(keys[ki + 1], (dout,), jnp.float32)
                rmean = 0.1 * jax.random.normal(keys[ki + 2], (dout,), jnp.float32)
                rvar = jax.random.uniform(keys[ki + 3], (dout,), jnp.float32, 0.5, 1.5)
                ki += 4
                self.bns.append((gamma, beta, rmean, rvar))

        self._build_padded_params()

    def _build_padded_params(self):
        """Zero-pad every feature dim to a multiple of 128 lanes, once."""
        self.in_pad = _round_up(self.input_size, LANE)
        self.out_pad = _round_up(self.layer_sizes[-1], LANE)

        padded = []
        din_p = self.in_pad
        for i, (w, b) in enumerate(self.linears):
            din, dout = w.shape
            dout_p = _round_up(dout, LANE)
            w_p = jnp.zeros((din_p, dout_p), jnp.float32).at[:din, :dout].set(w)
            is_last = i == len(self.linears) - 1
            if is_last:
                # padded logit lanes -> huge negative bias -> softmax prob 0
                b_p = jnp.full((1, dout_p), NEG_BIG, jnp.float32).at[0, :dout].set(b)
                padded.append((w_p, b_p, None, None))
            else:
                b_p = jnp.zeros((1, dout_p), jnp.float32).at[0, :dout].set(b)
                gamma, beta, rmean, rvar = self.bns[i]
                scale = gamma / jnp.sqrt(rvar + BN_EPS)
                shift = beta - rmean * scale
                scale_p = jnp.zeros((1, dout_p), jnp.float32).at[0, :dout].set(scale)
                shift_p = jnp.zeros((1, dout_p), jnp.float32).at[0, :dout].set(shift)
                padded.append((w_p, b_p, scale_p, shift_p))
            din_p = dout_p
        self.padded = padded

    def __call__(self, x):
        B, d = x.shape
        assert d == self.input_size, (d, self.input_size)

        # Batch tiling: one grid step for small batches, 128-row tiles otherwise.
        B_pad = _round_up(B, SUBLANE)
        if B_pad > 256:
            B_pad = _round_up(B, 128)
            tile_b = 128
        else:
            tile_b = B_pad
        nb = B_pad // tile_b

        x_p = jnp.zeros((B_pad, self.in_pad), jnp.float32).at[:B, :d].set(x)

        args = [x_p]
        in_specs = [pl.BlockSpec((tile_b, self.in_pad), lambda i: (i, 0))]

        def _full_spec(arr):
            shp = arr.shape
            return pl.BlockSpec(shp, lambda i, _s=shp: (0,) * len(_s))

        for (w_p, b_p, scale_p, shift_p) in self.padded[:-1]:
            for a in (w_p, b_p, scale_p, shift_p):
                args.append(a)
                in_specs.append(_full_spec(a))
        w_last, b_last, _, _ = self.padded[-1]
        for a in (w_last, b_last):
            args.append(a)
            in_specs.append(_full_spec(a))

        kernel = functools.partial(_net_kernel, num_hidden=self.num_hidden)
        out_p = pl.pallas_call(
            kernel,
            out_shape=jax.ShapeDtypeStruct((B_pad, self.out_pad), jnp.float32),
            grid=(nb,),
            in_specs=in_specs,
            out_specs=pl.BlockSpec((tile_b, self.out_pad), lambda i: (i, 0)),
            compiler_params=pltpu.CompilerParams(
                dimension_semantics=("parallel",)),
        )(*args)

        return out_p[:B, : self.layer_sizes[-1]]


# ---------------------------------------------------------------------------
# Plain-JAX reference (same semantics) for a correctness check
# ---------------------------------------------------------------------------
def reference_forward(net, x):
    h = x
    for i, (w, b) in enumerate(net.linears[:-1]):
        h = h @ w + b
        h = jnp.where(h > 0, h, NEG_SLOPE * h)
        gamma, beta, rmean, rvar = net.bns[i]
        h = (h - rmean) / jnp.sqrt(rvar + BN_EPS) * gamma + beta
    w, b = net.linears[-1]
    logits = h @ w + b
    return jax.nn.softmax(logits, axis=-1)


if __name__ == "__main__":
    key = jax.random.PRNGKey(0)
    k_params, k_x = jax.random.split(key)

    batch = 8
    input_size = 20
    layer_sizes = [64, 32, 10]   # last entry = number of classes (softmax dim)

    net = Net(input_size, layer_sizes, k_params)
    x = jax.random.normal(k_x, (batch, input_size), jnp.float32)

    probs = net(x)
    jax.block_until_ready(probs)

    ref = reference_forward(net, x)
    assert probs.shape == (batch, layer_sizes[-1])
    assert jnp.allclose(probs, ref, atol=1e-4, rtol=1e-4), float(
        jnp.max(jnp.abs(probs - ref)))
    assert jnp.allclose(jnp.sum(probs, axis=-1), 1.0, atol=1e-4)

    print("KERNEL_OK")
</pallas_src>

<mosaic_0001>
module attributes {stable_mosaic.version = 11 : i64} {
  func.func @_net_kernel(%arg0: i32, %arg1: memref<8x128xf32, #tpu.memory_space<vmem>>, %arg2: memref<128x128xf32, #tpu.memory_space<vmem>>, %arg3: memref<1x128xf32, #tpu.memory_space<vmem>>, %arg4: memref<1x128xf32, #tpu.memory_space<vmem>>, %arg5: memref<1x128xf32, #tpu.memory_space<vmem>>, %arg6: memref<128x128xf32, #tpu.memory_space<vmem>>, %arg7: memref<1x128xf32, #tpu.memory_space<vmem>>, %arg8: memref<1x128xf32, #tpu.memory_space<vmem>>, %arg9: memref<1x128xf32, #tpu.memory_space<vmem>>, %arg10: memref<128x128xf32, #tpu.memory_space<vmem>>, %arg11: memref<1x128xf32, #tpu.memory_space<vmem>>, %arg12: memref<8x128xf32, #tpu.memory_space<vmem>>) attributes {dimension_semantics = [#tpu.dimension_semantics<parallel>], iteration_bounds = array<i64: 1>, scalar_prefetch = 0 : i64, scratch_operands = 0 : i64, tpu.core_type = #tpu.core_type<tc>, window_params = [{transform_indices = @transform_0, window_bounds = array<i64: 8, 128>}, {pipeline_mode = #tpu.pipeline_mode<synchronous>, transform_indices = @transform_1, window_bounds = array<i64: 128, 128>}, {pipeline_mode = #tpu.pipeline_mode<synchronous>, transform_indices = @transform_2, window_bounds = array<i64: 1, 128>}, {pipeline_mode = #tpu.pipeline_mode<synchronous>, transform_indices = @transform_3, window_bounds = array<i64: 1, 128>}, {pipeline_mode = #tpu.pipeline_mode<synchronous>, transform_indices = @transform_4, window_bounds = array<i64: 1, 128>}, {pipeline_mode = #tpu.pipeline_mode<synchronous>, transform_indices = @transform_5, window_bounds = array<i64: 128, 128>}, {pipeline_mode = #tpu.pipeline_mode<synchronous>, transform_indices = @transform_6, window_bounds = array<i64: 1, 128>}, {pipeline_mode = #tpu.pipeline_mode<synchronous>, transform_indices = @transform_7, window_bounds = array<i64: 1, 128>}, {pipeline_mode = #tpu.pipeline_mode<synchronous>, transform_indices = @transform_8, window_bounds = array<i64: 1, 128>}, {pipeline_mode = #tpu.pipeline_mode<synchronous>, transform_indices = @transform_9, window_bounds = array<i64: 128, 128>}, {pipeline_mode = #tpu.pipeline_mode<synchronous>, transform_indices = @transform_10, window_bounds = array<i64: 1, 128>}, {transform_indices = @transform_11, window_bounds = array<i64: 8, 128>}]} {
    %c0 = arith.constant 0 : index
    %c0_0 = arith.constant 0 : index
    %0 = vector.load %arg1[%c0, %c0_0] : memref<8x128xf32, #tpu.memory_space<vmem>>, vector<8x128xf32>
    %c0_1 = arith.constant 0 : index
    %c0_2 = arith.constant 0 : index
    %1 = vector.load %arg2[%c0_1, %c0_2] : memref<128x128xf32, #tpu.memory_space<vmem>>, vector<128x128xf32>
    %c0_3 = arith.constant 0 : index
    %c0_4 = arith.constant 0 : index
    %2 = vector.load %arg3[%c0_3, %c0_4] : memref<1x128xf32, #tpu.memory_space<vmem>>, vector<1x128xf32>
    %c0_5 = arith.constant 0 : index
    %c0_6 = arith.constant 0 : index
    %3 = vector.load %arg4[%c0_5, %c0_6] : memref<1x128xf32, #tpu.memory_space<vmem>>, vector<1x128xf32>
    %c0_7 = arith.constant 0 : index
    %c0_8 = arith.constant 0 : index
    %4 = vector.load %arg5[%c0_7, %c0_8] : memref<1x128xf32, #tpu.memory_space<vmem>>, vector<1x128xf32>
    %cst = arith.constant dense<0.000000e+00> : vector<8x128xf32>
    %5 = tpu.matmul %0, %1, %cst {dimension_numbers = #tpu.dot_dimension_numbers<[1], [0], [0], [1], [0, 0, 1, 1], [], []>} : vector<8x128xf32>, vector<128x128xf32>, vector<8x128xf32> -> vector<8x128xf32>
    %6 = vector.broadcast %2 : vector<1x128xf32> to vector<8x128xf32>
    %7 = arith.addf %5, %6 : vector<8x128xf32>
    %cst_9 = arith.constant 0.000000e+00 : f32
    %8 = vector.broadcast %cst_9 : f32 to vector<8x128xf32>
    %9 = arith.cmpf ogt, %7, %8 : vector<8x128xf32>
    %cst_10 = arith.constant 0.00999999977 : f32
    %10 = vector.broadcast %cst_10 : f32 to vector<8x128xf32>
    %11 = arith.mulf %10, %7 : vector<8x128xf32>
    %12 = arith.select %9, %7, %11 : vector<8x128xi1>, vector<8x128xf32>
    %13 = vector.broadcast %3 : vector<1x128xf32> to vector<8x128xf32>
    %14 = arith.mulf %12, %13 : vector<8x128xf32>
    %15 = vector.broadcast %4 : vector<1x128xf32> to vector<8x128xf32>
    %16 = arith.addf %14, %15 : vector<8x128xf32>
    %c0_11 = arith.constant 0 : index
    %c0_12 = arith.constant 0 : index
    %17 = vector.load %arg6[%c0_11, %c0_12] : memref<128x128xf32, #tpu.memory_space<vmem>>, vector<128x128xf32>
    %c0_13 = arith.constant 0 : index
    %c0_14 = arith.constant 0 : index
    %18 = vector.load %arg7[%c0_13, %c0_14] : memref<1x128xf32, #tpu.memory_space<vmem>>, vector<1x128xf32>
    %c0_15 = arith.constant 0 : index
    %c0_16 = arith.constant 0 : index
    %19 = vector.load %arg8[%c0_15, %c0_16] : memref<1x128xf32, #tpu.memory_space<vmem>>, vector<1x128xf32>
    %c0_17 = arith.constant 0 : index
    %c0_18 = arith.constant 0 : index
    %20 = vector.load %arg9[%c0_17, %c0_18] : memref<1x128xf32, #tpu.memory_space<vmem>>, vector<1x128xf32>
    %cst_19 = arith.constant dense<0.000000e+00> : vector<8x128xf32>
    %21 = tpu.matmul %16, %17, %cst_19 {dimension_numbers = #tpu.dot_dimension_numbers<[1], [0], [0], [1], [0, 0, 1, 1], [], []>} : vector<8x128xf32>, vector<128x128xf32>, vector<8x128xf32> -> vector<8x128xf32>
    %22 = vector.broadcast %18 : vector<1x128xf32> to vector<8x128xf32>
    %23 = arith.addf %21, %22 : vector<8x128xf32>
    %cst_20 = arith.constant 0.000000e+00 : f32
    %24 = vector.broadcast %cst_20 : f32 to vector<8x128xf32>
    %25 = arith.cmpf ogt, %23, %24 : vector<8x128xf32>
    %cst_21 = arith.constant 0.00999999977 : f32
    %26 = vector.broadcast %cst_21 : f32 to vector<8x128xf32>
    %27 = arith.mulf %26, %23 : vector<8x128xf32>
    %28 = arith.select %25, %23, %27 : vector<8x128xi1>, vector<8x128xf32>
    %29 = vector.broadcast %19 : vector<1x128xf32> to vector<8x128xf32>
    %30 = arith.mulf %28, %29 : vector<8x128xf32>
    %31 = vector.broadcast %20 : vector<1x128xf32> to vector<8x128xf32>
    %32 = arith.addf %30, %31 : vector<8x128xf32>
    %c0_22 = arith.constant 0 : index
    %c0_23 = arith.constant 0 : index
    %33 = vector.load %arg10[%c0_22, %c0_23] : memref<128x128xf32, #tpu.memory_space<vmem>>, vector<128x128xf32>
    %c0_24 = arith.constant 0 : index
    %c0_25 = arith.constant 0 : index
    %34 = vector.load %arg11[%c0_24, %c0_25] : memref<1x128xf32, #tpu.memory_space<vmem>>, vector<1x128xf32>
    %cst_26 = arith.constant dense<0.000000e+00> : vector<8x128xf32>
    %35 = tpu.matmul %32, %33, %cst_26 {dimension_numbers = #tpu.dot_dimension_numbers<[1], [0], [0], [1], [0, 0, 1, 1], [], []>} : vector<8x128xf32>, vector<128x128xf32>, vector<8x128xf32> -> vector<8x128xf32>
    %36 = vector.broadcast %34 : vector<1x128xf32> to vector<8x128xf32>
    %37 = arith.addf %35, %36 : vector<8x128xf32>
    %cst_27 = arith.constant dense<0xFF800000> : vector<8xf32>
    %38 = vector.multi_reduction <maximumf>, %37, %cst_27 [1] : vector<8x128xf32> to vector<8xf32>
    %39 = vector.shape_cast %38 : vector<8xf32> to vector<8x1xf32>
    %40 = vector.broadcast %39 : vector<8x1xf32> to vector<8x128xf32>
    %41 = arith.subf %37, %40 : vector<8x128xf32>
    %42 = math.exp %41 : vector<8x128xf32>
    %cst_28 = arith.constant dense<0.000000e+00> : vector<8xf32>
    %43 = vector.multi_reduction <add>, %42, %cst_28 [1] : vector<8x128xf32> to vector<8xf32>
    %44 = vector.shape_cast %43 : vector<8xf32> to vector<8x1xf32>
    %45 = vector.broadcast %44 : vector<8x1xf32> to vector<8x128xf32>
    %46 = arith.divf %42, %45 : vector<8x128xf32>
    %c0_29 = arith.constant 0 : index
    %c0_30 = arith.constant 0 : index
    %47 = vector.load %arg12[%c0_29, %c0_30] : memref<8x128xf32, #tpu.memory_space<vmem>>, vector<8x128xf32>
    tpu.vector_store %arg12[%c0_29, %c0_30], %46 {strides = array<i32>} : memref<8x128xf32, #tpu.memory_space<vmem>>, vector<8x128xf32>,
    return
  }
  func.func @transform_0(%arg0: i32) -> (i32, i32) {
    %c0_i32 = arith.constant 0 : i32
    %c0_i32_0 = arith.constant 0 : i32
    return %arg0, %c0_i32 : i32, i32
  }
  func.func @transform_1(%arg0: i32) -> (i32, i32) {
    %c0_i32 = arith.constant 0 : i32
    %c0_i32_0 = arith.constant 0 : i32
    %c0_i32_1 = arith.constant 0 : i32
    return %c0_i32, %c0_i32_0 : i32, i32
  }
  func.func @transform_2(%arg0: i32) -> (i32, i32) {
    %c0_i32 = arith.constant 0 : i32
    %c0_i32_0 = arith.constant 0 : i32
    %c0_i32_1 = arith.constant 0 : i32
    return %c0_i32, %c0_i32_0 : i32, i32
  }
  func.func @transform_3(%arg0: i32) -> (i32, i32) {
    %c0_i32 = arith.constant 0 : i32
    %c0_i32_0 = arith.constant 0 : i32
    %c0_i32_1 = arith.constant 0 : i32
    return %c0_i32, %c0_i32_0 : i32, i32
  }
  func.func @transform_4(%arg0: i32) -> (i32, i32) {
    %c0_i32 = arith.constant 0 : i32
    %c0_i32_0 = arith.constant 0 : i32
    %c0_i32_1 = arith.constant 0 : i32
    return %c0_i32, %c0_i32_0 : i32, i32
  }
  func.func @transform_5(%arg0: i32) -> (i32, i32) {
    %c0_i32 = arith.constant 0 : i32
    %c0_i32_0 = arith.constant 0 : i32
    %c0_i32_1 = arith.constant 0 : i32
    return %c0_i32, %c0_i32_0 : i32, i32
  }
  func.func @transform_6(%arg0: i32) -> (i32, i32) {
    %c0_i32 = arith.constant 0 : i32
    %c0_i32_0 = arith.constant 0 : i32
    %c0_i32_1 = arith.constant 0 : i32
    return %c0_i32, %c0_i32_0 : i32, i32
  }
  func.func @transform_7(%arg0: i32) -> (i32, i32) {
    %c0_i32 = arith.constant 0 : i32
    %c0_i32_0 = arith.constant 0 : i32
    %c0_i32_1 = arith.constant 0 : i32
    return %c0_i32, %c0_i32_0 : i32, i32
  }
  func.func @transform_8(%arg0: i32) -> (i32, i32) {
    %c0_i32 = arith.constant 0 : i32
    %c0_i32_0 = arith.constant 0 : i32
    %c0_i32_1 = arith.constant 0 : i32
    return %c0_i32, %c0_i32_0 : i32, i32
  }
  func.func @transform_9(%arg0: i32) -> (i32, i32) {
    %c0_i32 = arith.constant 0 : i32
    %c0_i32_0 = arith.constant 0 : i32
    %c0_i32_1 = arith.constant 0 : i32
    return %c0_i32, %c0_i32_0 : i32, i32
  }
  func.func @transform_10(%arg0: i32) -> (i32, i32) {
    %c0_i32 = arith.constant 0 : i32
    %c0_i32_0 = arith.constant 0 : i32
    %c0_i32_1 = arith.constant 0 : i32
    return %c0_i32, %c0_i32_0 : i32, i32
  }
  func.func @transform_11(%arg0: i32) -> (i32, i32) {
    %c0_i32 = arith.constant 0 : i32
    %c0_i32_0 = arith.constant 0 : i32
    return %arg0, %c0_i32 : i32, i32
  }
}

</mosaic_0001>

<bundles_post_ra>
// kernel: tpu_custom_call.1
= control target key start
LH: loop header
LB: loop body
LE: loop exit
PB: predicated region body
PF: predicated region fallthrough
CT: control target
= control target key end

     0   :  { %16 = vsyncpa [#allocation3], 0  ;;  %s538_s0 = inlined_call_operand.hbm [shape: f32[8,128], index: 0, kind: input, shape index: {}]   ;;  %s539_s1 = inlined_call_operand.hbm [shape: f32[128,128], index: 1, kind: input, shape index: {}]   ;;  %s540_s2 = inlined_call_operand.vmem [shape: f32[1,128], index: 2, kind: input, shape index: {}]   ;;  %s541_s3 = inlined_call_operand.vmem [shape: f32[1,128], index: 3, kind: input, shape index: {}]   ;;  %s542_s4 = inlined_call_operand.vmem [shape: f32[1,128], index: 4, kind: input, shape index: {}]   ;;  %s543_s5 = inlined_call_operand.hbm [shape: f32[128,128], index: 5, kind: input, shape index: {}]   ;;  %s544_s6 = inlined_call_operand.vmem [shape: f32[1,128], index: 6, kind: input, shape index: {}]   ;;  %s545_s7 = inlined_call_operand.vmem [shape: f32[1,128], index: 7, kind: input, shape index: {}]   ;;  %s546_s8 = inlined_call_operand.vmem [shape: f32[1,128], index: 8, kind: input, shape index: {}]   ;;  %s547_s9 = inlined_call_operand.hbm [shape: f32[128,128], index: 9, kind: input, shape index: {}]   ;;  %s548_s10 = inlined_call_operand.vmem [shape: f32[1,128], index: 10, kind: input, shape index: {}]   ;;  %s549_s11 = inlined_call_operand.hbm [shape: f32[8,128], index: 11, kind: output, shape index: {}]  }
   0x1   :  { %17 = vsyncpa [#allocation6], 0 }
   0x2   :  { %18 = vsyncpa [#allocation9], 0  ;;  %s35_s19 = sshll.u32 %s539_s1, 4  ;;  %s36_s19 = int_to_ptr.hbm [resolvable:$true] %s35_s19 }
   0x3   :  { %19 = vsyncpa [#allocation4], 0  ;;  %s435_s20 = smov [#allocation5]   ;;  %s25_s24 = sshll.u32 %s538_s0, 4  ;;  %s26_s24 = int_to_ptr.hbm [resolvable:$true] %s25_s24 }
   0x4   :  { %s37_s21 = sshll.u32 %s435_s20, 4  ;;  %s436_s25 = smov 128   ;;  %s38_s21 = int_to_ptr.vmem [resolvable:$true] %s37_s21 }
   0x5   :  { %s437_s26 = smov 8   ;;  %s438_s27 = smov [#allocation2]  }
   0x6   :  { %43 = dma.hbm_to_vmem [thread:$0]  %s36_s19, 2048, %s38_s21, [#allocation6], %s436_s25, %s436_s25, %s437_s26  }
   0x7   :  { %s27_s28 = sshll.u32 %s438_s27, 4  ;;  %s54_s12 = sshll.u32 %s543_s5, 4  ;;  %s28_s28 = int_to_ptr.vmem [resolvable:$true] %s27_s28  ;;  %s55_s12 = int_to_ptr.hbm [resolvable:$true] %s54_s12 }
   0x8   :  { %30 = dma.hbm_to_vmem [thread:$0]  %s26_s24, 128, %s28_s28, [#allocation3]  }
   0x9   :  { %s73_s14 = sshll.u32 %s547_s9, 4  ;;  %s439_s15 = smov [#allocation7]   ;;  %s74_s14 = int_to_ptr.hbm [resolvable:$true] %s73_s14 }
   0xa   :  { %s56_s16 = sshll.u32 %s439_s15, 4  ;;  %s440_s0 = smov [#allocation8]   ;;  %s57_s16 = int_to_ptr.vmem [resolvable:$true] %s56_s16 }
   0xb   :  { %62 = dma.hbm_to_vmem [thread:$0]  %s55_s12, 2048, %s57_s16, [#allocation6], %s436_s25, %s436_s25, %s437_s26  }
   0xc   :  { %s75_s17 = sshll.u32 %s440_s0, 4  ;;  %s76_s17 = int_to_ptr.vmem [resolvable:$true] %s75_s17 }
   0xd   :  { %81 = dma.hbm_to_vmem [thread:$0]  %s74_s14, 2048, %s76_s17, [#allocation9], %s436_s25, %s436_s25, %s437_s26  }
   0xe   :  { %427 = dma.done.wait [#allocation3], 128  }
   0xf   :  { %428 = vsyncadd [#allocation3], 4294967168 }
  0x10   :  { %429 = dma.done.wait [#allocation6], 4096  }
  0x11   :  { %430 = vsyncadd [#allocation6], 4294963200 }
  0x12   :  { %431 = dma.done.wait [#allocation9], 2048  }
  0x13   :  { %432 = vsyncadd [#allocation9], 4294965248  ;;  %v116_v0 = vld [vmem:[#allocation5 + $0x78] sm:$0xff]  ;;  %v115_v1 = vld [vmem:[#allocation5 + $0x70] sm:$0xff]  ;;  %s277_s27 = sshll.u32 %s549_s11, 4  ;;  %s278_s27 = int_to_ptr.hbm [resolvable:$true] %s277_s27 }
  0x14   :  { %123 = vmatpush.msra.mxu0 %v116_v0  ;;  %v114_v2 = vld [vmem:[#allocation5 + $0x68] sm:$0xff]  ;;  %v113_v3 = vld [vmem:[#allocation5 + $0x60] sm:$0xff]  ;;  %v169_v4 = vld [vmem:[#allocation7 + $0x78] sm:$0xff] }
  0x15   :  { %v112_v5 = vld [vmem:[#allocation5 + $0x58] sm:$0xff]  ;;  %176 = vmatpush.msra.mxu1 %v169_v4  ;;  %v168_v6 = vld [vmem:[#allocation7 + $0x70] sm:$0xff]  ;;  %v167_v7 = vld [vmem:[#allocation7 + $0x68] sm:$0xff] }
  0x16   :  { %124 = vmatpush.msra.mxu0 %v115_v1  ;;  %v111_v8 = vld [vmem:[#allocation5 + $0x50] sm:$0xff]  ;;  %v110_v9 = vld [vmem:[#allocation5 + $0x48] sm:$0xff]  ;;  %v166_v10 = vld [vmem:[#allocation7 + $0x60] sm:$0xff] }
  0x17   :  { %177 = vmatpush.msra.mxu1 %v168_v6  ;;  %v165_v11 = vld [vmem:[#allocation7 + $0x58] sm:$0xff]  ;;  %v109_v12 = vld [vmem:[#allocation5 + $0x40] sm:$0xff]  ;;  %v164_v13 = vld [vmem:[#allocation7 + $0x50] sm:$0xff] }
  0x18   :  { %125 = vmatpush.msra.mxu0 %v114_v2  ;;  %v108_v14 = vld [vmem:[#allocation5 + $0x38] sm:$0xff]  ;;  %v163_v15 = vld [vmem:[#allocation7 + $0x48] sm:$0xff]  ;;  %v107_v16 = vld [vmem:[#allocation5 + $0x30] sm:$0xff] }
  0x19   :  { %178 = vmatpush.msra.mxu1 %v167_v7  ;;  %v162_v17 = vld [vmem:[#allocation7 + $0x40] sm:$0xff]  ;;  %v106_v18 = vld [vmem:[#allocation5 + $0x28] sm:$0xff]  ;;  %v161_v19 = vld [vmem:[#allocation7 + $0x38] sm:$0xff] }
  0x1a   :  { %126 = vmatpush.msra.mxu0 %v113_v3  ;;  %v105_v20 = vld [vmem:[#allocation5 + $0x20] sm:$0xff]  ;;  %v160_v21 = vld [vmem:[#allocation7 + $0x30] sm:$0xff]  ;;  %v104_v22 = vld [vmem:[#allocation5 + $0x18] sm:$0xff] }
  0x1b   :  { %179 = vmatpush.msra.mxu1 %v166_v10  ;;  %v159_v23 = vld [vmem:[#allocation7 + $0x28] sm:$0xff]  ;;  %v103_v24 = vld [vmem:[#allocation5 + $0x10] sm:$0xff]  ;;  %v101_v26 = vld [vmem:[#allocation5] sm:$0xff] }
  0x1c   :  { %127 = vmatpush.msra.mxu0 %v112_v5  ;;  %v102_v25 = vld [vmem:[#allocation5 + $0x8] sm:$0xff]  ;;  %v100_v27 = vld [vmem:[#allocation2] sm:$0xff]  ;;  %v158_v28 = vld [vmem:[#allocation7 + $0x20] sm:$0xff] }
  0x1d   :  { %180 = vmatpush.msra.mxu1 %v165_v11  ;;  %v157_v29 = vld [vmem:[#allocation7 + $0x18] sm:$0xff]  ;;  %v156_v30 = vld [vmem:[#allocation7 + $0x10] sm:$0xff]  ;;  %v155_v31 = vld [vmem:[#allocation7 + $0x8] sm:$0xff] }
  0x1e   :  { %128 = vmatpush.msra.mxu0 %v111_v8  ;;  %v154_v32 = vld [vmem:[#allocation7] sm:$0xff]  ;;  %v222_v33 = vld [vmem:[#allocation8 + $0x78] sm:$0xff]  ;;  %v221_v34 = vld [vmem:[#allocation8 + $0x70] sm:$0xff] }
  0x1f   :  { %181 = vmatpush.msra.mxu1 %v164_v13  ;;  %227 = vmatpush.msra.mxu2 %v222_v33  ;;  %v220_v35 = vld [vmem:[#allocation8 + $0x68] sm:$0xff]  ;;  %v219_v36 = vld [vmem:[#allocation8 + $0x60] sm:$0xff]  ;;  %v218_v37 = vld [vmem:[#allocation8 + $0x58] sm:$0xff] }
  0x20   :  { %129 = vmatpush.msra.mxu0 %v110_v9  ;;  %v217_v38 = vld [vmem:[#allocation8 + $0x50] sm:$0xff]  ;;  %v216_v39 = vld [vmem:[#allocation8 + $0x48] sm:$0xff]  ;;  %v215_v40 = vld [vmem:[#allocation8 + $0x40] sm:$0xff] }
  0x21   :  { %182 = vmatpush.msra.mxu1 %v163_v15  ;;  %228 = vmatpush.msra.mxu2 %v221_v34  ;;  %v214_v41 = vld [vmem:[#allocation8 + $0x38] sm:$0xff]  ;;  %v213_v42 = vld [vmem:[#allocation8 + $0x30] sm:$0xff]  ;;  %v212_v43 = vld [vmem:[#allocation8 + $0x28] sm:$0xff] }
  0x22   :  { %130 = vmatpush.msra.mxu0 %v109_v12  ;;  %v296_v44 = vld [vmem:[%s540_s2] ss:$0 sm:$0xff]  ;;  %v211_v53 = vld [vmem:[#allocation8 + $0x20] sm:$0xff]  ;;  %v209_v55 = vld [vmem:[#allocation8 + $0x10] sm:$0xff] }
  0x23   :  { %183 = vmatpush.msra.mxu1 %v162_v17  ;;  %229 = vmatpush.msra.mxu2 %v220_v35  ;;  %v297_v47 = vld [vmem:[%s541_s3] ss:$0 sm:$0xff]  ;;  %v208_v56 = vld [vmem:[#allocation8 + $0x8] sm:$0xff]  ;;  %v207_v57 = vld [vmem:[#allocation8] sm:$0xff] }
  0x24   :  { %131 = vmatpush.msra.mxu0 %v108_v14  ;;  %v298_v49 = vld [vmem:[%s542_s4] ss:$0 sm:$0xff] }
  0x25   :  { %184 = vmatpush.msra.mxu1 %v161_v19  ;;  %230 = vmatpush.msra.mxu2 %v219_v36  ;;  %v210_v54 = vld [vmem:[#allocation8 + $0x18] sm:$0xff] }
  0x26   :  { %132 = vmatpush.msra.mxu0 %v107_v16  ;;  %v299_v58 = vld [vmem:[%s544_s6] ss:$0 sm:$0xff]  ;;  %s441_s6 = smov [#allocation10]  }
  0x27   :  { %185 = vmatpush.msra.mxu1 %v160_v21  ;;  %231 = vmatpush.msra.mxu2 %v218_v37  ;;  %v300_v61 = vld [vmem:[%s545_s7] ss:$0 sm:$0xff]  ;;  %s275_s7 = sshll.u32 %s441_s6, 4  ;;  %s276_s7 = int_to_ptr.vmem [resolvable:$true] %s275_s7 }
  0x28   :  { %133 = vmatpush.msra.mxu0 %v106_v18  ;;  %v301_v63 = vld [vmem:[%s546_s8] ss:$0 sm:$0xff] }
  0x29   :  { %186 = vmatpush.msra.mxu1 %v159_v23  ;;  %232 = vmatpush.msra.mxu2 %v217_v38  ;;  %v302_v3 = vld [vmem:[%s548_s10] ss:$0 sm:$0xff] }
  0x2a   :  { %134 = vmatpush.msra.mxu0 %v105_v20 }
  0x2b   :  { %187 = vmatpush.msra.mxu1 %v158_v28  ;;  %233 = vmatpush.msra.mxu2 %v216_v39 }
  0x2c   :  { %135 = vmatpush.msra.mxu0 %v104_v22 }
  0x2d   :  { %188 = vmatpush.msra.mxu1 %v157_v29  ;;  %234 = vmatpush.msra.mxu2 %v215_v40 }
  0x2e   :  { %136 = vmatpush.msra.mxu0 %v103_v24 }
  0x2f   :  { %189 = vmatpush.msra.mxu1 %v156_v30  ;;  %235 = vmatpush.msra.mxu2 %v214_v41 }
  0x30   :  { %137 = vmatpush.msra.mxu0 %v102_v25 }
  0x31   :  { %190 = vmatpush.msra.mxu1 %v155_v31  ;;  %236 = vmatpush.msra.mxu2 %v213_v42 }
  0x32   :  { %138 = vmatpush.msra.mxu0 %v101_v26 }
  0x33   :  { %139 = vmatmul.f32.vlgmr.msra.gmra.mxu0 %v100_v27  ;;  %191 = vmatpush.msra.mxu1 %v154_v32 }
  0x34   :  { %237 = vmatpush.msra.mxu2 %v212_v43 }
  0x36   :  { %238 = vmatpush.msra.mxu2 %v211_v53 }
  0x38   :  { %239 = vmatpush.msra.mxu2 %v210_v54 }
  0x3a   :  { %240 = vmatpush.msra.mxu2 %v209_v55 }
  0x3c   :  { %241 = vmatpush.msra.mxu2 %v208_v56 }
  0x3e   :  { %242 = vmatpush.msra.mxu2 %v207_v57 }
  0xb0   :  { %v140_v45 = vpop.f32.mrf.mxu0 }
  0xb1   :  { %v141_v46 = vadd.f32 %v296_v44, %v140_v45 }
  0xb3   :  { %vm143_vm0 = vcmp.gt.f32.partialorder %v141_v46, 0.0  ;;  %v144_v48 = vmul.f32 0.01, %v141_v46 }
  0xb5   :  { %v145_v50 = vsel %vm143_vm0, %v141_v46, %v144_v48 }
  0xb6   :  { %v149_v51 = vmul.f32 %v297_v47, %v145_v50 }
  0xb8   :  { %v153_v52 = vadd.f32 %v298_v49, %v149_v51 }
  0xba   :  { %192 = vmatmul.f32.vlgmr.msra.gmra.mxu1 %v153_v52 }
 0x137   :  { %v193_v59 = vpop.f32.mrf.mxu1 }
 0x138   :  { %v194_v60 = vadd.f32 %v299_v58, %v193_v59 }
 0x13a   :  { %vm196_vm1 = vcmp.gt.f32.partialorder %v194_v60, 0.0  ;;  %v197_v62 = vmul.f32 0.01, %v194_v60 }
 0x13c   :  { %v198_v0 = vsel %vm196_vm1, %v194_v60, %v197_v62 }
 0x13d   :  { %v202_v1 = vmul.f32 %v300_v61, %v198_v0 }
 0x13f   :  { %v206_v2 = vadd.f32 %v301_v63, %v202_v1 }
 0x141   :  { %243 = vmatmul.f32.vlgmr.msra.gmra.mxu2 %v206_v2 }
 0x1c4   :  { %v244_v4 = vpop.f32.mrf.mxu2 }
 0x1c5   :  { %v245_v5 = vadd.f32 %v302_v3, %v244_v4 }
 0x1c7   :  { %247 = vmax.xlane.f32.xlu0 %v245_v5 }
 0x23a   :  { %v248_v6 = vpop.xlane.xlu0 %247 }
 0x23b   :  { %v249_v7 = vsub.f32 %v245_v5, %v248_v6 }
 0x23d   :  { %v250_v8 = vmul.f32 1.442695, %v249_v7 }
 0x23f   :  { %303 = vpow2.f32 %v250_v8 }
 0x245   :  { %v304_v9 = vpop.eup %303 }
 0x246   :  { %252 = vadd.xlane.f32.xlu0 %v304_v9 }
 0x2b9   :  { %v253_v10 = vpop.xlane.xlu0 %252 }
 0x2ba   :  { %305 = vrcp.f32 %v253_v10  ;;  %v265_v14 = vand.u32 2147483648, %v253_v10  ;;  %v263_v16 = vand.u32 2147483647, %v253_v10  ;;  %vm259_vm3 = vweird.f32 %v253_v10 }
 0x2bc   :  { %v266_v18 = vor.u32 1.1754944e-38, %v265_v14  ;;  %vm264_vm5 = vcmp.eq.f32.partialorder %v263_v16, 8.507059e+37 }
 0x2c0   :  { %v306_v11 = vpop.eup %305 }
 0x2c1   :  { %v255_v12 = vmul.f32 %v306_v11, %v253_v10  ;;  %vm260_vm2 = vweird.f32 %v306_v11 }
 0x2c2   :  { %vm261_vm4 = vmor %vm259_vm3, %vm260_vm2 }
 0x2c3   :  { %v256_v13 = vsub.f32 1.0, %v255_v12 }
 0x2c5   :  { %v257_v15 = vmul.f32 %v306_v11, %v256_v13 }
 0x2c7   :  { %v258_v17 = vadd.f32 %v306_v11, %v257_v15 }
 0x2c9   :  { %v262_v19 = vsel %vm261_vm4, %v306_v11, %v258_v17 }
 0x2ca   :  { %v267_v20 = vsel %vm264_vm5, %v266_v18, %v262_v19 }
 0x2cb   :  { %v268_v21 = vmul.f32 %v304_v9, %v267_v20 }
 0x2cd   :  { %269 = vst [vmem:[#allocation10] sm:$0xff] %v268_v21 }
 0x2ce   :  { %280 = dma.vmem_to_hbm [thread:$0]  %s276_s7, 128, %s278_s27, [#allocation4]  }
 0x2cf   :  { %433 = dma.done.wait [#allocation4], 128  }
 0x2d0   :  { %434 = vsyncadd [#allocation4], 4294967168 }
 0x2d1   :  { %285 = vsyncpa [#allocation3], 1 }
 0x2d2   :  { %286 = vsyncpa [#allocation6], 1 }
 0x2d3   :  { %287 = vsyncpa [#allocation9], 1 }
 0x2d4   :  { %288 = vsyncpa [#allocation4], 1 }

</bundles_post_ra>
